<compile_context>
chip_gen: v7x
topology: tpu7x:2x2x1
jax: 0.10.0
libtpu: 0.0.40
codegen_flags: <defaults>
</compile_context>

<pallas_src>
import functools

import jax
import jax.numpy as jnp
import numpy as np
from jax.experimental import pallas as pl
from jax.experimental.pallas import tpu as pltpu

EPS = 1e-5
LANE = 128
_VMEM_LIMIT = 32 * 1024 * 1024


# ------------------------------ small helpers -------------------------------

def _round_up(x, m):
    return (x + m - 1) // m * m


def _pick_tm(m):
    """Row-tile size: 256 for big M, otherwise the (8-aligned) full M."""
    return 256 if m >= 256 else _round_up(m, 8)


def _pad_rows(a, m_pad):
    m = a.shape[0]
    if m == m_pad:
        return a
    return jnp.pad(a, ((0, m_pad - m), (0, 0)))


def _pad_cols(w, c_pad):
    k, c = w.shape
    if c == c_pad:
        return w
    return jnp.pad(w, ((0, 0), (0, c_pad - c)))


def _pad_row_param(v, c_pad, fill):
    v = v.reshape(1, -1).astype(jnp.float32)
    c = v.shape[1]
    if c == c_pad:
        return v
    pad = jnp.full((1, c_pad - c), fill, jnp.float32)
    return jnp.concatenate([v, pad], axis=1)


# ------------------------------ Pallas kernels -------------------------------

def _conv_bn_stats_kernel(a_ref, w_ref, gamma_ref, beta_ref,
                          out_ref, scale_ref, bias_ref, *, true_m):
    """Tiled conv-as-matmul (bf16 -> MXU, fp32 acc) + cross-tile BN stats.

    scale_ref / bias_ref are (1, C) fp32 outputs resident across the M grid
    axis; they carry the running per-channel sum / sum-of-squares and are
    overwritten with the folded affine rows (scale, bias) at the last step.
    """
    i = pl.program_id(0)

    @pl.when(i == 0)
    def _():
        scale_ref[...] = jnp.zeros_like(scale_ref)
        bias_ref[...] = jnp.zeros_like(bias_ref)

    acc = jnp.dot(a_ref[...], w_ref[...], preferred_element_type=jnp.float32)
    out_ref[...] = acc.astype(out_ref.dtype)

    scale_ref[...] += jnp.sum(acc, axis=0, keepdims=True)        # running sum
    bias_ref[...] += jnp.sum(acc * acc, axis=0, keepdims=True)   # running sum x^2

    @pl.when(i == pl.num_programs(0) - 1)
    def _():
        inv_m = jnp.float32(1.0 / true_m)
        mean = scale_ref[...] * inv_m
        var = jnp.maximum(bias_ref[...] * inv_m - mean * mean, 0.0)
        a = gamma_ref[...] * jax.lax.rsqrt(var + EPS)
        scale_ref[...] = a
        bias_ref[...] = beta_ref[...] - mean * a


def _affine_act_kernel(x_ref, a_ref, b_ref, o_ref, *, relu):
    """BN folded to a single FMA per element (+ optional ReLU)."""
    y = x_ref[...].astype(jnp.float32) * a_ref[...] + b_ref[...]
    if relu:
        y = jnp.maximum(y, 0.0)
    o_ref[...] = y.astype(o_ref.dtype)


def _affine_add_relu_kernel(x_ref, a_ref, b_ref, sc_ref, o_ref):
    """relu(bn2(x) + identity_shortcut)."""
    y = x_ref[...].astype(jnp.float32) * a_ref[...] + b_ref[...]
    y = y + sc_ref[...].astype(jnp.float32)
    o_ref[...] = jnp.maximum(y, 0.0).astype(o_ref.dtype)


def _affine2_add_relu_kernel(x_ref, a_ref, b_ref, sc_ref, as_ref, bs_ref, o_ref):
    """relu(bn2(x) + bn_s(shortcut_conv))   (both BNs folded to FMAs)."""
    y = x_ref[...].astype(jnp.float32) * a_ref[...] + b_ref[...]
    y = y + sc_ref[...].astype(jnp.float32) * as_ref[...] + bs_ref[...]
    o_ref[...] = jnp.maximum(y, 0.0).astype(o_ref.dtype)


# ------------------------------ Pallas wrappers ------------------------------

def conv_bn_stats(patches, weight, gamma, beta, *, true_m, tm):
    """patches (Mp, K) bf16, weight (K, C) bf16 -> (conv bf16, scale f32, bias f32)."""
    m_pad, k = patches.shape
    c = weight.shape[1]
    row = pl.BlockSpec((1, c), lambda i: (0, 0))
    return pl.pallas_call(
        functools.partial(_conv_bn_stats_kernel, true_m=true_m),
        grid=(m_pad // tm,),
        in_specs=[pl.BlockSpec((tm, k), lambda i: (i, 0)),
                  pl.BlockSpec((k, c), lambda i: (0, 0)),
                  row, row],
        out_specs=(pl.BlockSpec((tm, c), lambda i: (i, 0)), row, row),
        out_shape=(jax.ShapeDtypeStruct((m_pad, c), jnp.bfloat16),
                   jax.ShapeDtypeStruct((1, c), jnp.float32),
                   jax.ShapeDtypeStruct((1, c), jnp.float32)),
        compiler_params=pltpu.CompilerParams(
            dimension_semantics=("arbitrary",),      # carried BN-stat accumulation
            vmem_limit_bytes=_VMEM_LIMIT),
    )(patches, weight, gamma, beta)


def affine_act(x, scale, bias, *, relu, tm, out_dtype):
    m_pad, c = x.shape
    row = pl.BlockSpec((1, c), lambda i: (0, 0))
    full = pl.BlockSpec((tm, c), lambda i: (i, 0))
    return pl.pallas_call(
        functools.partial(_affine_act_kernel, relu=relu),
        grid=(m_pad // tm,),
        in_specs=[full, row, row],
        out_specs=full,
        out_shape=jax.ShapeDtypeStruct((m_pad, c), out_dtype),
        compiler_params=pltpu.CompilerParams(
            dimension_semantics=("parallel",), vmem_limit_bytes=_VMEM_LIMIT),
    )(x, scale, bias)


def affine_add_relu(x, scale, bias, shortcut, *, tm):
    m_pad, c = x.shape
    row = pl.BlockSpec((1, c), lambda i: (0, 0))
    full = pl.BlockSpec((tm, c), lambda i: (i, 0))
    return pl.pallas_call(
        _affine_add_relu_kernel,
        grid=(m_pad // tm,),
        in_specs=[full, row, row, full],
        out_specs=full,
        out_shape=jax.ShapeDtypeStruct((m_pad, c), jnp.float32),
        compiler_params=pltpu.CompilerParams(
            dimension_semantics=("parallel",), vmem_limit_bytes=_VMEM_LIMIT),
    )(x, scale, bias, shortcut)


def affine2_add_relu(x, scale, bias, shortcut, scale_s, bias_s, *, tm):
    m_pad, c = x.shape
    row = pl.BlockSpec((1, c), lambda i: (0, 0))
    full = pl.BlockSpec((tm, c), lambda i: (i, 0))
    return pl.pallas_call(
        _affine2_add_relu_kernel,
        grid=(m_pad // tm,),
        in_specs=[full, row, row, full, row, row],
        out_specs=full,
        out_shape=jax.ShapeDtypeStruct((m_pad, c), jnp.float32),
        compiler_params=pltpu.CompilerParams(
            dimension_semantics=("parallel",), vmem_limit_bytes=_VMEM_LIMIT),
    )(x, scale, bias, shortcut, scale_s, bias_s)


# --------------------------------- JAX glue ----------------------------------

def _im2col_3x3(x_nhwc, stride):
    """3x3, pad=1 patch extraction (kept in the input dtype, e.g. bf16)."""
    n, h, w, cin = x_nhwc.shape
    ho = (h + 2 - 3) // stride + 1
    wo = (w + 2 - 3) // stride + 1
    xp = jnp.pad(x_nhwc, ((0, 0), (1, 1), (1, 1), (0, 0)))
    cols = []
    for ky in range(3):
        for kx in range(3):
            sl = xp[:, ky:ky + stride * (ho - 1) + 1:stride,
                       kx:kx + stride * (wo - 1) + 1:stride, :]
            cols.append(sl)
    patches = jnp.concatenate(cols, axis=-1)                 # (N, Ho, Wo, 9*Cin)
    return patches.reshape(n * ho * wo, 9 * cin), (n, ho, wo)


def init_basic_block(key, in_planes, planes, stride):
    """Deterministic parameter init mirroring BasicBlock.__init__ shapes."""
    k1, k2, k3 = jax.random.split(key, 3)
    params = dict(
        stride=stride,
        w1=jax.random.normal(k1, (3, 3, in_planes, planes), jnp.float32) * 0.1,
        gamma1=jnp.ones((planes,), jnp.float32),
        beta1=jnp.zeros((planes,), jnp.float32),
        w2=jax.random.normal(k2, (3, 3, planes, planes), jnp.float32) * 0.1,
        gamma2=jnp.ones((planes,), jnp.float32),
        beta2=jnp.zeros((planes,), jnp.float32),
    )
    if stride != 1 or in_planes != planes:
        params["ws"] = jax.random.normal(k3, (in_planes, planes), jnp.float32) * 0.1
        params["gammas"] = jnp.ones((planes,), jnp.float32)
        params["betas"] = jnp.zeros((planes,), jnp.float32)
    return params


def basic_block_forward(params, x_nchw):
    x = jnp.transpose(x_nchw, (0, 2, 3, 1)).astype(jnp.float32)   # NHWC
    n, h, w, cin = x.shape
    s = params["stride"]
    planes = params["w1"].shape[-1]
    c_pad = _round_up(planes, LANE)          # lane-dense output channels

    ho = (h + 2 - 3) // s + 1
    wo = (w + 2 - 3) // s + 1
    m = n * ho * wo
    tm = _pick_tm(m)
    m_pad = _round_up(m, tm)

    x_bf = x.astype(jnp.bfloat16)

    # ---- conv1 + folded bn1 affine rows -------------------------------------
    p1, _ = _im2col_3x3(x_bf, s)                                   # (M, 9*Cin) bf16
    p1 = _pad_rows(p1, m_pad)
    w1 = _pad_cols(params["w1"].reshape(9 * cin, planes), c_pad).astype(jnp.bfloat16)
    g1 = _pad_row_param(params["gamma1"], c_pad, 1.0)
    b1 = _pad_row_param(params["beta1"], c_pad, 0.0)
    c1, a1, bb1 = conv_bn_stats(p1, w1, g1, b1, true_m=m, tm=tm)

    # ---- bn1 + relu (single FMA per element, bf16 out) ----------------------
    out1 = affine_act(c1, a1, bb1, relu=True, tm=tm, out_dtype=jnp.bfloat16)
    out1 = out1[:m].reshape(n, ho, wo, c_pad)

    # ---- conv2 + folded bn2 --------------------------------------------------
    p2, _ = _im2col_3x3(out1, 1)                                   # (M, 9*c_pad) bf16
    p2 = _pad_rows(p2, m_pad)
    w2_full = jnp.zeros((3, 3, c_pad, c_pad), jnp.float32)
    w2_full = w2_full.at[:, :, :planes, :planes].set(params["w2"])
    w2 = w2_full.reshape(9 * c_pad, c_pad).astype(jnp.bfloat16)
    g2 = _pad_row_param(params["gamma2"], c_pad, 1.0)
    b2 = _pad_row_param(params["beta2"], c_pad, 0.0)
    c2, a2, bb2 = conv_bn_stats(p2, w2, g2, b2, true_m=m, tm=tm)

    # ---- shortcut + fused bn2 / shortcut-bn / add / relu --------------------
    if "ws" in params:
        xs = x_bf[:, ::s, ::s, :].reshape(m, cin)                  # 1x1 stride-s conv
        xs = _pad_rows(xs, m_pad)
        ws = _pad_cols(params["ws"], c_pad).astype(jnp.bfloat16)
        gs = _pad_row_param(params["gammas"], c_pad, 1.0)
        bs = _pad_row_param(params["betas"], c_pad, 0.0)
        cs, a_s, b_s = conv_bn_stats(xs, ws, gs, bs, true_m=m, tm=tm)
        out = affine2_add_relu(c2, a2, bb2, cs, a_s, b_s, tm=tm)
    else:
        sc = jnp.pad(x_bf, ((0, 0), (0, 0), (0, 0), (0, c_pad - cin)))
        sc = _pad_rows(sc.reshape(m, c_pad), m_pad)
        out = affine_add_relu(c2, a2, bb2, sc, tm=tm)

    out = out[:m, :planes].reshape(n, ho, wo, planes)
    return jnp.transpose(out, (0, 3, 1, 2))                        # back to NCHW


# -------------------------------- pure-JAX ref --------------------------------

def _ref_forward(params, x_nchw):
    x = jnp.transpose(x_nchw, (0, 2, 3, 1)).astype(jnp.float32)
    s = params["stride"]

    def conv3(y, wgt, stride):
        return jax.lax.conv_general_dilated(
            y, wgt, (stride, stride), ((1, 1), (1, 1)),
            dimension_numbers=("NHWC", "HWIO", "NHWC"))

    def bn(y, gamma, beta):
        mean = jnp.mean(y, axis=(0, 1, 2), keepdims=True)
        var = jnp.var(y, axis=(0, 1, 2), keepdims=True)
        return ((y - mean) * jax.lax.rsqrt(var + EPS)
                * gamma.reshape(1, 1, 1, -1) + beta.reshape(1, 1, 1, -1))

    y = jax.nn.relu(bn(conv3(x, params["w1"], s), params["gamma1"], params["beta1"]))
    y = bn(conv3(y, params["w2"], 1), params["gamma2"], params["beta2"])
    if "ws" in params:
        wgt = params["ws"].reshape(1, 1, *params["ws"].shape)
        sc = jax.lax.conv_general_dilated(
            x, wgt, (s, s), ((0, 0), (0, 0)),
            dimension_numbers=("NHWC", "HWIO", "NHWC"))
        sc = bn(sc, params["gammas"], params["betas"])
    else:
        sc = x
    return jnp.transpose(jax.nn.relu(y + sc), (0, 3, 1, 2))


# ----------------------------------- main -------------------------------------

if __name__ == "__main__":
    key = jax.random.PRNGKey(0)
    kx, kp1, kp2 = jax.random.split(key, 3)

    # Case 1: downsampling block (stride=2, 4 -> 8 channels -> conv shortcut)
    x = jax.random.normal(kx, (2, 4, 16, 16), jnp.float32)
    params = init_basic_block(kp1, in_planes=4, planes=8, stride=2)
    out = jax.block_until_ready(basic_block_forward(params, x))
    assert out.shape == (2, 8, 8, 8)
    ref = _ref_forward(params, x)
    # bf16 MXU operands / bf16 inter-kernel activations -> looser tolerance.
    np.testing.assert_allclose(np.asarray(out), np.asarray(ref), atol=5e-2, rtol=5e-2)

    # Case 2: identity-shortcut block (stride=1, same channels)
    params_id = init_basic_block(kp2, in_planes=4, planes=4, stride=1)
    out_id = jax.block_until_ready(basic_block_forward(params_id, x))
    assert out_id.shape == (2, 4, 16, 16)
    ref_id = _ref_forward(params_id, x)
    np.testing.assert_allclose(np.asarray(out_id), np.asarray(ref_id), atol=5e-2, rtol=5e-2)

    print("KERNEL_OK")
</pallas_src>

<mosaic_0001>
module attributes {stable_mosaic.version = 11 : i64} {
  func.func @_conv_bn_stats_kernel(%arg0: i32, %arg1: memref<128x36xbf16, #tpu.memory_space<vmem>>, %arg2: memref<36x128xbf16, #tpu.memory_space<vmem>>, %arg3: memref<1x128xf32, #tpu.memory_space<vmem>>, %arg4: memref<1x128xf32, #tpu.memory_space<vmem>>, %arg5: memref<128x128xbf16, #tpu.memory_space<vmem>>, %arg6: memref<1x128xf32, #tpu.memory_space<vmem>>, %arg7: memref<1x128xf32, #tpu.memory_space<vmem>>) attributes {dimension_semantics = [#tpu.dimension_semantics<arbitrary>], iteration_bounds = array<i64: 1>, scalar_prefetch = 0 : i64, scratch_operands = 0 : i64, tpu.core_type = #tpu.core_type<tc>, window_params = [{transform_indices = @transform_0, window_bounds = array<i64: 128, 36>}, {pipeline_mode = #tpu.pipeline_mode<synchronous>, transform_indices = @transform_1, window_bounds = array<i64: 36, 128>}, {pipeline_mode = #tpu.pipeline_mode<synchronous>, transform_indices = @transform_2, window_bounds = array<i64: 1, 128>}, {pipeline_mode = #tpu.pipeline_mode<synchronous>, transform_indices = @transform_3, window_bounds = array<i64: 1, 128>}, {transform_indices = @transform_4, window_bounds = array<i64: 128, 128>}, {pipeline_mode = #tpu.pipeline_mode<synchronous>, transform_indices = @transform_5, window_bounds = array<i64: 1, 128>}, {pipeline_mode = #tpu.pipeline_mode<synchronous>, transform_indices = @transform_6, window_bounds = array<i64: 1, 128>}]} {
    %c0_i32 = arith.constant 0 : i32
    %0 = arith.cmpi eq, %arg0, %c0_i32 : i32
    %1 = arith.extui %0 : i1 to i32
    %c0_i32_0 = arith.constant 0 : i32
    %2 = arith.cmpi ne, %1, %c0_i32_0 : i32
    scf.if %2 {
      %cst_18 = arith.constant 0.000000e+00 : f32
      %22 = vector.broadcast %cst_18 : f32 to vector<1x128xf32>
      %c0_19 = arith.constant 0 : index
      %c0_20 = arith.constant 0 : index
      %23 = vector.load %arg6[%c0_19, %c0_20] : memref<1x128xf32, #tpu.memory_space<vmem>>, vector<1x128xf32>
      tpu.vector_store %arg6[%c0_19, %c0_20], %22 {strides = array<i32>} : memref<1x128xf32, #tpu.memory_space<vmem>>, vector<1x128xf32>,
      %cst_21 = arith.constant 0.000000e+00 : f32
      %24 = vector.broadcast %cst_21 : f32 to vector<1x128xf32>
      %c0_22 = arith.constant 0 : index
      %c0_23 = arith.constant 0 : index
      %25 = vector.load %arg7[%c0_22, %c0_23] : memref<1x128xf32, #tpu.memory_space<vmem>>, vector<1x128xf32>
      tpu.vector_store %arg7[%c0_22, %c0_23], %24 {strides = array<i32>} : memref<1x128xf32, #tpu.memory_space<vmem>>, vector<1x128xf32>,
    } else {
    }
    %c0 = arith.constant 0 : index
    %c0_1 = arith.constant 0 : index
    %3 = vector.load %arg1[%c0, %c0_1] : memref<128x36xbf16, #tpu.memory_space<vmem>>, vector<128x36xbf16>
    %c0_2 = arith.constant 0 : index
    %c0_3 = arith.constant 0 : index
    %4 = vector.load %arg2[%c0_2, %c0_3] : memref<36x128xbf16, #tpu.memory_space<vmem>>, vector<36x128xbf16>
    %cst = arith.constant dense<0.000000e+00> : vector<128x128xf32>
    %5 = tpu.matmul %3, %4, %cst {dimension_numbers = #tpu.dot_dimension_numbers<[1], [0], [0], [1], [0, 0, 1, 1], [], []>} : vector<128x36xbf16>, vector<36x128xbf16>, vector<128x128xf32> -> vector<128x128xf32>
    %6 = arith.truncf %5 : vector<128x128xf32> to vector<128x128xbf16>
    %c0_4 = arith.constant 0 : index
    %c0_5 = arith.constant 0 : index
    %7 = vector.load %arg5[%c0_4, %c0_5] : memref<128x128xbf16, #tpu.memory_space<vmem>>, vector<128x128xbf16>
    tpu.vector_store %arg5[%c0_4, %c0_5], %6 {strides = array<i32>} : memref<128x128xbf16, #tpu.memory_space<vmem>>, vector<128x128xbf16>,
    %c0_6 = arith.constant 0 : index
    %c0_7 = arith.constant 0 : index
    %8 = vector.load %arg6[%c0_6, %c0_7] : memref<1x128xf32, #tpu.memory_space<vmem>>, vector<1x128xf32>
    %cst_8 = arith.constant dense<0.000000e+00> : vector<128xf32>
    %9 = vector.multi_reduction <add>, %5, %cst_8 [0] : vector<128x128xf32> to vector<128xf32>
    %10 = vector.shape_cast %9 : vector<128xf32> to vector<1x128xf32>
    %11 = arith.addf %8, %10 : vector<1x128xf32>
    %c0_9 = arith.constant 0 : index
    %c0_10 = arith.constant 0 : index
    %12 = vector.load %arg6[%c0_9, %c0_10] : memref<1x128xf32, #tpu.memory_space<vmem>>, vector<1x128xf32>
    tpu.vector_store %arg6[%c0_9, %c0_10], %11 {strides = array<i32>} : memref<1x128xf32, #tpu.memory_space<vmem>>, vector<1x128xf32>,
    %c0_11 = arith.constant 0 : index
    %c0_12 = arith.constant 0 : index
    %13 = vector.load %arg7[%c0_11, %c0_12] : memref<1x128xf32, #tpu.memory_space<vmem>>, vector<1x128xf32>
    %14 = arith.mulf %5, %5 : vector<128x128xf32>
    %cst_13 = arith.constant dense<0.000000e+00> : vector<128xf32>
    %15 = vector.multi_reduction <add>, %14, %cst_13 [0] : vector<128x128xf32> to vector<128xf32>
    %16 = vector.shape_cast %15 : vector<128xf32> to vector<1x128xf32>
    %17 = arith.addf %13, %16 : vector<1x128xf32>
    %c0_14 = arith.constant 0 : index
    %c0_15 = arith.constant 0 : index
    %18 = vector.load %arg7[%c0_14, %c0_15] : memref<1x128xf32, #tpu.memory_space<vmem>>, vector<1x128xf32>
    tpu.vector_store %arg7[%c0_14, %c0_15], %17 {strides = array<i32>} : memref<1x128xf32, #tpu.memory_space<vmem>>, vector<1x128xf32>,
    %c0_i32_16 = arith.constant 0 : i32
    %19 = arith.cmpi eq, %arg0, %c0_i32_16 : i32
    %20 = arith.extui %19 : i1 to i32
    %c0_i32_17 = arith.constant 0 : i32
    %21 = arith.cmpi ne, %20, %c0_i32_17 : i32
    scf.if %21 {
      %c0_18 = arith.constant 0 : index
      %c0_19 = arith.constant 0 : index
      %22 = vector.load %arg6[%c0_18, %c0_19] : memref<1x128xf32, #tpu.memory_space<vmem>>, vector<1x128xf32>
      %cst_20 = arith.constant 7.812500e-03 : f32
      %23 = vector.broadcast %cst_20 : f32 to vector<1x128xf32>
      %24 = arith.mulf %22, %23 : vector<1x128xf32>
      %c0_21 = arith.constant 0 : index
      %c0_22 = arith.constant 0 : index
      %25 = vector.load %arg7[%c0_21, %c0_22] : memref<1x128xf32, #tpu.memory_space<vmem>>, vector<1x128xf32>
      %cst_23 = arith.constant 7.812500e-03 : f32
      %26 = vector.broadcast %cst_23 : f32 to vector<1x128xf32>
      %27 = arith.mulf %25, %26 : vector<1x128xf32>
      %28 = arith.mulf %24, %24 : vector<1x128xf32>
      %29 = arith.subf %27, %28 : vector<1x128xf32>
      %cst_24 = arith.constant 0.000000e+00 : f32
      %30 = vector.broadcast %cst_24 : f32 to vector<1x128xf32>
      %31 = arith.maximumf %29, %30 : vector<1x128xf32>
      %c0_25 = arith.constant 0 : index
      %c0_26 = arith.constant 0 : index
      %32 = vector.load %arg3[%c0_25, %c0_26] : memref<1x128xf32, #tpu.memory_space<vmem>>, vector<1x128xf32>
      %cst_27 = arith.constant 9.99999974E-6 : f32
      %33 = vector.broadcast %cst_27 : f32 to vector<1x128xf32>
      %34 = arith.addf %31, %33 : vector<1x128xf32>
      %35 = math.rsqrt %34 : vector<1x128xf32>
      %36 = arith.mulf %32, %35 : vector<1x128xf32>
      %c0_28 = arith.constant 0 : index
      %c0_29 = arith.constant 0 : index
      %37 = vector.load %arg6[%c0_28, %c0_29] : memref<1x128xf32, #tpu.memory_space<vmem>>, vector<1x128xf32>
      tpu.vector_store %arg6[%c0_28, %c0_29], %36 {strides = array<i32>} : memref<1x128xf32, #tpu.memory_space<vmem>>, vector<1x128xf32>,
      %c0_30 = arith.constant 0 : index
      %c0_31 = arith.constant 0 : index
      %38 = vector.load %arg4[%c0_30, %c0_31] : memref<1x128xf32, #tpu.memory_space<vmem>>, vector<1x128xf32>
      %39 = arith.mulf %24, %36 : vector<1x128xf32>
      %40 = arith.subf %38, %39 : vector<1x128xf32>
      %c0_32 = arith.constant 0 : index
      %c0_33 = arith.constant 0 : index
      %41 = vector.load %arg7[%c0_32, %c0_33] : memref<1x128xf32, #tpu.memory_space<vmem>>, vector<1x128xf32>
      tpu.vector_store %arg7[%c0_32, %c0_33], %40 {strides = array<i32>} : memref<1x128xf32, #tpu.memory_space<vmem>>, vector<1x128xf32>,
    } else {
    }
    return
  }
  func.func @transform_0(%arg0: i32) -> (i32, i32) {
    %c0_i32 = arith.constant 0 : i32
    %c0_i32_0 = arith.constant 0 : i32
    return %arg0, %c0_i32 : i32, i32
  }
  func.func @transform_1(%arg0: i32) -> (i32, i32) {
    %c0_i32 = arith.constant 0 : i32
    %c0_i32_0 = arith.constant 0 : i32
    %c0_i32_1 = arith.constant 0 : i32
    return %c0_i32, %c0_i32_0 : i32, i32
  }
  func.func @transform_2(%arg0: i32) -> (i32, i32) {
    %c0_i32 = arith.constant 0 : i32
    %c0_i32_0 = arith.constant 0 : i32
    %c0_i32_1 = arith.constant 0 : i32
    return %c0_i32, %c0_i32_0 : i32, i32
  }
  func.func @transform_3(%arg0: i32) -> (i32, i32) {
    %c0_i32 = arith.constant 0 : i32
    %c0_i32_0 = arith.constant 0 : i32
    %c0_i32_1 = arith.constant 0 : i32
    return %c0_i32, %c0_i32_0 : i32, i32
  }
  func.func @transform_4(%arg0: i32) -> (i32, i32) {
    %c0_i32 = arith.constant 0 : i32
    %c0_i32_0 = arith.constant 0 : i32
    return %arg0, %c0_i32 : i32, i32
  }
  func.func @transform_5(%arg0: i32) -> (i32, i32) {
    %c0_i32 = arith.constant 0 : i32
    %c0_i32_0 = arith.constant 0 : i32
    %c0_i32_1 = arith.constant 0 : i32
    return %c0_i32, %c0_i32_0 : i32, i32
  }
  func.func @transform_6(%arg0: i32) -> (i32, i32) {
    %c0_i32 = arith.constant 0 : i32
    %c0_i32_0 = arith.constant 0 : i32
    %c0_i32_1 = arith.constant 0 : i32
    return %c0_i32, %c0_i32_0 : i32, i32
  }
}

</mosaic_0001>

<bundles_post_ra>
// kernel: tpu_custom_call.1
= control target key start
LH: loop header
LB: loop body
LE: loop exit
PB: predicated region body
PF: predicated region fallthrough
CT: control target
= control target key end

     0   :  { %12 = vsyncpa [#allocation3], 0  ;;  %vm105_vm0 = vcmask 293888   ;;  %vm130_vm1 = vcmask 1041408   ;;  %s826_s0 = inlined_call_operand.vmem [shape: bf16[128,36], index: 0, kind: input, shape index: {}]   ;;  %s827_s1 = inlined_call_operand.vmem [shape: bf16[36,128], index: 1, kind: input, shape index: {}]   ;;  %s828_s2 = inlined_call_operand.vmem [shape: f32[1,128], index: 2, kind: input, shape index: {}]   ;;  %s829_s3 = inlined_call_operand.vmem [shape: f32[1,128], index: 3, kind: input, shape index: {}]   ;;  %s830_s4 = inlined_call_operand.hbm [shape: bf16[128,128], index: 4, kind: output, shape index: {0}]   ;;  %s831_s5 = inlined_call_operand.hbm [shape: f32[1,128], index: 5, kind: output, shape index: {1}]   ;;  %s832_s6 = inlined_call_operand.hbm [shape: f32[1,128], index: 6, kind: output, shape index: {2}]  }
   0x1   :  { %v582_v0 = vld [vmem:[%s827_s1] sm:$0xff]   ;;  %v583_v1 = vld [vmem:[%s827_s1 + $0x8] sm:$0xff]   ;;  %v584_v2 = vld [vmem:[%s827_s1 + $0x10] ss:$0 sps:$4 sm:$0x33]  }
   0x2   :  { %546 = vmatprep.subr.bf16.mxu0 %v582_v0  ;;  %v585_v3 = vld [vmem:[%s826_s0] sm:$0xff]   ;;  %568 = vmatprep.subr.bf16.mxu1 %v582_v0  ;;  %v132_v5 = vsel %vm130_vm1, %v584_v2, 0  ;;  %v586_v6 = vld [vmem:[%s826_s0 + $0x8] sm:$0xff]  }
   0x3   :  { %547 = vmatpush3.bf16.msra.mxu0 %v582_v0  ;;  %571 = vmatpush3.bf16.msra.mxu1 %v582_v0  ;;  %v589_v4 = vld [vmem:[%s826_s0 + $0x20] sm:$0xff]   ;;  %v590_v7 = vld [vmem:[%s826_s0 + $0x28] sm:$0xff]  }
   0x4   :  { %548 = vmatprep.subr.bf16.mxu0 %v583_v1  ;;  %552 = vmatprep.mubr.msk.bf16.mxu0 %vm105_vm0, %v585_v3 }
   0x5   :  { %569 = vmatprep.subr.bf16.mxu1 %v583_v1  ;;  %560 = vmatprep.mubr.msk.bf16.mxu1 %vm105_vm0, %v589_v4 }
   0x7   :  { %549 = vmatpush3.bf16.msra.mxu0 %v583_v1  ;;  %572 = vmatpush3.bf16.msra.mxu1 %v583_v1 }
   0x8   :  { %574 = vmatprep.subr.msk.bf16.mxu0 %vm130_vm1, %v584_v2  ;;  %575 = vmatprep.subr.msk.bf16.mxu1 %vm130_vm1, %v584_v2 }
   0x9   :  { %13 = vsyncpa [#allocation5], 0  ;;  %v587_v8 = vld [vmem:[%s826_s0 + $0x10] sm:$0xff]   ;;  %v588_v10 = vld [vmem:[%s826_s0 + $0x18] sm:$0xff]   ;;  %v665_v12 = vmov 0.0  }
   0xa   :  { %v591_v9 = vld [vmem:[%s826_s0 + $0x30] sm:$0xff]   ;;  %v592_v11 = vld [vmem:[%s826_s0 + $0x38] sm:$0xff]   ;;  %27 = vst [vmem:[#allocation4] sm:$0x1] %v665_v12  ;;  %28 = vst [vmem:[#allocation6] sm:$0x1] %v665_v12 }
   0xb   :  { %551 = vmatpush3.bf16.msra.mxu0 %v132_v5  ;;  %573 = vmatpush3.bf16.msra.mxu1 %v132_v5  ;;  %s666_s0 = smov [#allocation2]  }
   0xc   :  { %s399_s18 = sshll.u32 %s666_s0, 4  ;;  %s762_s18 = int_to_ptr.vmem [resolvable:$true] %s399_s18 }
   0xd   :  { %s595_s19 = scalar_lea.vmem %s762_s18, 1024  ;;  %p600_p1 = scmp.lt.s32.totalorder %s762_s18, %s762_s18 }
   0xe   :  { %553 = vmatmul.mubr.msk.bf16.vlgmr.msra.gmra.mrb[0].mxu0 %vm105_vm0, %v586_v6  ;;  %561 = vmatmul.mubr.msk.bf16.vlgmr.msra.gmra.mrb[0].mxu1 %vm105_vm0, %v590_v7  ;;  %p596_p0 = scmp.ne.s32.totalorder %s762_s18, %s595_s19  ;;  %p601_p2 = scmp.lt.s32.totalorder %s595_s19, %s595_s19 }
   0xf   :  { %556 = vmatprep.mubr.msk.bf16.mxu0 %vm105_vm0, %v587_v8  ;;  %564 = vmatprep.mubr.msk.bf16.mxu1 %vm105_vm0, %v591_v9 }
  0x10   :  { %p602_p3 = por %p601_p2, %p600_p1 }
  0x12   :  { %p603_p4 = pnand %p602_p3, %p596_p0 }
  0x16   :  { %557 = vmatmul.mubr.msk.bf16.gmra.mrb[4].mxu0 %vm105_vm0, %v588_v10  ;;  %565 = vmatmul.mubr.msk.bf16.gmra.mrb[4].mxu1 %vm105_vm0, %v592_v11 }
  0xe1   :  { %v554_v13 = vpop.f32.mrb[0].mxu0  ;;  %v747_v14 = vpop.f32.mrb[0].mxu1 }
  0xe2   :  { %v168_v15 = vpop.f32.mrb[1].mxu0  ;;  %v749_v16 = vpop.f32.mrb[1].mxu1  ;;  %v338_v28 = vmul.f32 %v554_v13, %v554_v13 }
  0xe3   :  { %v555_v17 = vpop.f32.mrb[2].mxu0  ;;  %v751_v18 = vpop.f32.mrb[2].mxu1  ;;  %v336_v19 = vmul.f32 %v168_v15, %v168_v15  ;;  %v344_v58 = vmul.f32 %v749_v16, %v749_v16 }
  0xe4   :  { %v496_v20 = vpack.c.bf16 %v555_v17, %v554_v13  ;;  %v171_v21 = vpop.f32.mrb[3].mxu0  ;;  %v516_v22 = vpack.c.bf16 %v751_v18, %v747_v14  ;;  %v755_v23 = vpop.f32.mrb[3].mxu1  ;;  %v339_v31 = vmul.f32 %v555_v17, %v555_v17 }
  0xe5   :  { %v491_v24 = vpack.c.bf16 %v171_v21, %v168_v15  ;;  %v312_v25 = vadd.f32 %v171_v21, %v168_v15  ;;  %v337_v26 = vmul.f32 %v171_v21, %v171_v21  ;;  %v511_v27 = vpack.c.bf16 %v755_v23, %v749_v16 }
  0xe6   :  { %528 = vst [vmem:[#allocation2 + $0x8] sm:$0xff] %v496_v20   ;;  %532 = vst [vmem:[#allocation2 + $0x28] sm:$0xff] %v516_v22  }
  0xe7   :  { %492 = vst [vmem:[#allocation2] sm:$0xff] %v491_v24   ;;  %v313_v29 = vadd.f32 %v554_v13, %v312_v25  ;;  %v352_v30 = vadd.f32 %v337_v26, %v336_v19  ;;  %531 = vst [vmem:[#allocation2 + $0x20] sm:$0xff] %v511_v27  }
  0xe9   :  { %v353_v32 = vadd.f32 %v352_v30, %v338_v28  ;;  %v558_v33 = vpop.f32.mrb[4].mxu0  ;;  %v314_v34 = vadd.f32 %v555_v17, %v313_v29  ;;  %v759_v35 = vpop.f32.mrb[4].mxu1 }
  0xea   :  { %v184_v36 = vpop.f32.mrb[5].mxu0  ;;  %v216_v37 = vpop.f32.mrb[5].mxu1  ;;  %v342_v52 = vmul.f32 %v558_v33, %v558_v33 }
  0xeb   :  { %v315_v38 = vadd.f32 %v314_v34, %v184_v36  ;;  %v340_v39 = vmul.f32 %v184_v36, %v184_v36  ;;  %v354_v40 = vadd.f32 %v353_v32, %v339_v31  ;;  %v559_v41 = vpop.f32.mrb[6].mxu0  ;;  %v567_v42 = vpop.f32.mrb[6].mxu1 }
  0xec   :  { %v506_v43 = vpack.c.bf16 %v559_v41, %v558_v33  ;;  %v187_v44 = vpop.f32.mrb[7].mxu0  ;;  %v526_v45 = vpack.c.bf16 %v567_v42, %v759_v35  ;;  %v219_v46 = vpop.f32.mrb[7].mxu1  ;;  %v343_v55 = vmul.f32 %v559_v41, %v559_v41 }
  0xed   :  { %v355_v47 = vadd.f32 %v354_v40, %v340_v39  ;;  %v501_v48 = vpack.c.bf16 %v187_v44, %v184_v36  ;;  %v316_v49 = vadd.f32 %v315_v38, %v187_v44  ;;  %v341_v50 = vmul.f32 %v187_v44, %v187_v44 }
  0xee   :  { %530 = vst [vmem:[#allocation2 + $0x18] sm:$0xff] %v506_v43   ;;  %534 = vst [vmem:[#allocation2 + $0x38] sm:$0xff] %v526_v45   ;;  %v521_v51 = vpack.c.bf16 %v219_v46, %v216_v37 }
  0xef   :  { %529 = vst [vmem:[#allocation2 + $0x10] sm:$0xff] %v501_v48   ;;  %v317_v53 = vadd.f32 %v558_v33, %v316_v49  ;;  %v356_v54 = vadd.f32 %v355_v47, %v341_v50 }
  0xf0   :  { %533 = vst [vmem:[#allocation2 + $0x30] sm:$0xff] %v521_v51  }
  0xf1   :  { %v357_v56 = vadd.f32 %v356_v54, %v342_v52  ;;  %v318_v57 = vadd.f32 %v559_v41, %v317_v53 }
  0xf2   :  { %606 = shalt.err (!%p603_p4)
}
  0xf3   :  { %s607_s22 = scalar_lea.hbm %s830_s4, 1024 }
  0xf4   :  { %p608_p5 = scmp.ne.s32.totalorder %s830_s4, %s607_s22  ;;  %p611_p6 = scmp.lt.u32.totalorder %s607_s22, %s830_s4 }
  0xf6   :  { %p613_p7 = pnand %p611_p6, %p608_p5 }
  0xf8   :  { %616 = shalt.err (!%p613_p7)
}
  0xf9   :  { %s667_s27 = smov 64   ;;  %s668_s28 = smov 4   ;;  %v319_v59 = vadd.f32 %v318_v57, %v749_v16  ;;  %v358_v60 = vadd.f32 %v357_v56, %v343_v55  ;;  %v345_v63 = vmul.f32 %v755_v23, %v755_v23  ;;  %v346_v0 = vmul.f32 %v747_v14, %v747_v14  ;;  %v311_v28 = vld [vmem:[#allocation4] sm:$0x1]  ;;  %v335_v31 = vld [vmem:[#allocation6] sm:$0x1] }
  0xfa   :  { %405 = dma.vmem_to_hbm [thread:$0]  %s762_s18, 1024, %s830_s4, [#allocation3], %s667_s27, %s667_s27, %s668_s28   ;;  %v347_v3 = vmul.f32 %v751_v18, %v751_v18  ;;  %v348_v6 = vmul.f32 %v216_v37, %v216_v37  ;;  %v349_v11 = vmul.f32 %v219_v46, %v219_v46  ;;  %v350_v12 = vmul.f32 %v759_v35, %v759_v35 }
  0xfb   :  { %v359_v61 = vadd.f32 %v358_v60, %v344_v58  ;;  %v320_v62 = vadd.f32 %v319_v59, %v755_v23  ;;  %v385_v43 = vld [vmem:[%s828_s2] sm:$0x1]  ;;  %s669_s7 = smov [#allocation4]   ;;  %s670_s11 = smov [#allocation6]  }
  0xfc   :  { %s412_s8 = sshll.u32 %s669_s7, 4  ;;  %s422_s12 = sshll.u32 %s670_s11, 4  ;;  %s413_s8 = int_to_ptr.vmem [resolvable:$true] %s412_s8  ;;  %s423_s12 = int_to_ptr.vmem [resolvable:$true] %s422_s12 }
  0xfd   :  { %v321_v1 = vadd.f32 %v747_v14, %v320_v62  ;;  %v360_v2 = vadd.f32 %v359_v61, %v345_v63  ;;  %v351_v14 = vmul.f32 %v567_v42, %v567_v42  ;;  %s617_s13 = scalar_lea.vmem %s413_s8, 16  ;;  %s621_s14 = scalar_lea.vmem %s413_s8, 32 }
  0xfe   :  { %p618_p8 = scmp.ne.s32.totalorder %s413_s8, %s617_s13  ;;  %p622_p9 = scmp.lt.s32.totalorder %s413_s8, %s413_s8 }
  0xff   :  { %v361_v4 = vadd.f32 %v360_v2, %v346_v0  ;;  %v322_v5 = vadd.f32 %v751_v18, %v321_v1  ;;  %p623_p10 = scmp.lt.s32.totalorder %s621_s14, %s617_s13 }
 0x101   :  { %v323_v7 = vadd.f32 %v322_v5, %v216_v37  ;;  %v362_v8 = vadd.f32 %v361_v4, %v347_v3  ;;  %p624_p11 = por %p623_p10, %p622_p9 }
 0x103   :  { %v363_v9 = vadd.f32 %v362_v8, %v348_v6  ;;  %v324_v10 = vadd.f32 %v323_v7, %v219_v46  ;;  %v390_v46 = vld [vmem:[%s829_s3] sm:$0x1]  ;;  %p625_p12 = pnand %p624_p11, %p618_p8 }
 0x105   :  { %v325_v13 = vadd.f32 %v759_v35, %v324_v10  ;;  %v364_v15 = vadd.f32 %v363_v9, %v349_v11 }
 0x107   :  { %v326_v16 = vadd.f32 %v567_v42, %v325_v13  ;;  %v365_v17 = vadd.f32 %v364_v15, %v350_v12 }
 0x109   :  { %v327_v19 = vrot.slane %v326_v16, 4  ;;  %v366_v20 = vadd.f32 %v365_v17, %v351_v14 }
 0x10b   :  { %v328_v21 = vadd.f32 %v327_v19, %v326_v16  ;;  %v367_v22 = vrot.slane %v366_v20, 4 }
 0x10d   :  { %v329_v18 = vrot.slane %v328_v21, 2  ;;  %v368_v23 = vadd.f32 %v367_v22, %v366_v20 }
 0x10f   :  { %v330_v24 = vadd.f32 %v329_v18, %v328_v21  ;;  %v369_v25 = vrot.slane %v368_v23, 2 }
 0x111   :  { %v331_v26 = vrot.slane %v330_v24, 1  ;;  %v370_v27 = vadd.f32 %v369_v25, %v368_v23 }
 0x113   :  { %v371_v29 = vrot.slane %v370_v27, 1  ;;  %v332_v30 = vadd.f32 %v331_v26, %v330_v24 }
 0x115   :  { %v372_v32 = vadd.f32 %v371_v29, %v370_v27  ;;  %v333_v33 = vadd.f32 %v332_v30, %v311_v28 }
 0x117   :  { %334 = vst [vmem:[#allocation4] sm:$0x1] %v333_v33  ;;  %v373_v34 = vadd.f32 %v372_v32, %v335_v31 }
 0x119   :  { %374 = vst [vmem:[#allocation6] sm:$0x1] %v373_v34 }
 0x11e   :  { %v378_v35 = vld [vmem:[#allocation4] sm:$0x1] }
 0x11f   :  { %v379_v36 = vmul.f32 0.0078125, %v378_v35 }
 0x120   :  { %v380_v37 = vld [vmem:[#allocation6] sm:$0x1] }
 0x121   :  { %v381_v38 = vmul.f32 0.0078125, %v380_v37  ;;  %v382_v39 = vmul.f32 %v379_v36, %v379_v36 }
 0x123   :  { %v383_v40 = vsub.f32 %v381_v38, %v382_v39 }
 0x125   :  { %v384_v41 = vmax.f32 %v383_v40, 0.0 }
 0x127   :  { %v386_v42 = vadd.f32 1e-05, %v384_v41 }
 0x129   :  { %593 = vrsqrt.f32 %v386_v42 }
 0x133   :  { %v594_v44 = vpop.eup %593 }
 0x134   :  { %v388_v45 = vmul.f32 %v594_v44, %v385_v43 }
 0x136   :  { %389 = vst [vmem:[#allocation4] sm:$0x1] %v388_v45  ;;  %v391_v47 = vmul.f32 %v388_v45, %v379_v36 }
 0x137   :  { %628 = shalt.err (!%p625_p12)
}
 0x138   :  { %s629_s16 = scalar_lea.hbm %s831_s5, 16 }
 0x139   :  { %p630_p13 = scmp.ne.s32.totalorder %s831_s5, %s629_s16  ;;  %p633_p0 = scmp.lt.u32.totalorder %s629_s16, %s831_s5 }
 0x13b   :  { %p635_p1 = pnand %p633_p0, %p630_p13 }
 0x13d   :  { %638 = shalt.err (!%p635_p1)
}
 0x13e   :  { %415 = dma.vmem_to_hbm [thread:$0]  %s413_s8, 16, %s831_s5, [#allocation5]   ;;  %v392_v48 = vsub.f32 %v390_v46, %v391_v47 }
 0x13f   :  { %s639_s21 = scalar_lea.vmem %s423_s12, 16  ;;  %s643_s22 = scalar_lea.vmem %s423_s12, 32 }
 0x140   :  { %393 = vst [vmem:[#allocation6] sm:$0x1] %v392_v48  ;;  %p640_p2 = scmp.ne.s32.totalorder %s423_s12, %s639_s21  ;;  %p644_p3 = scmp.lt.s32.totalorder %s423_s12, %s423_s12 }
 0x141   :  { %p645_p4 = scmp.lt.s32.totalorder %s643_s22, %s639_s21 }
 0x143   :  { %p646_p5 = por %p645_p4, %p644_p3 }
 0x145   :  { %p647_p6 = pnand %p646_p5, %p640_p2 }
 0x147   :  { %650 = shalt.err (!%p647_p6)
}
 0x148   :  { %s651_s25 = scalar_lea.hbm %s832_s6, 16 }
 0x149   :  { %p652_p7 = scmp.ne.s32.totalorder %s832_s6, %s651_s25  ;;  %p655_p8 = scmp.lt.u32.totalorder %s651_s25, %s832_s6 }
 0x14b   :  { %p657_p9 = pnand %p655_p8, %p652_p7 }
 0x14d   :  { %660 = shalt.err (!%p657_p9)
}
 0x14e   :  { %425 = dma.vmem_to_hbm [thread:$0]  %s423_s12, 16, %s832_s6, [#allocation5]  }
 0x14f   :  { %661 = dma.done.wait [#allocation3], 1024  }
 0x150   :  { %662 = vsyncadd [#allocation3], 4294966272 }
 0x151   :  { %663 = dma.done.wait [#allocation5], 32  }
 0x152   :  { %664 = vsyncadd [#allocation5], 4294967264 }
 0x153   :  { %435 = vsyncpa [#allocation3], 1 }
 0x154   :  { %436 = vsyncpa [#allocation5], 1 }

</bundles_post_ra>
